<compile_context>
chip_gen: v7x
topology: tpu7x:2x2x1
jax: 0.10.0
libtpu: 0.0.40
codegen_flags: <defaults>
</compile_context>

<pallas_src>
import jax
import jax.numpy as jnp
from jax.experimental import pallas as pl
from jax.experimental.pallas import tpu as pltpu


IN_F, H1, H2 = 3, 16, 8


def livenet_kernel(xT_ref, w1a_ref, w2t_ref, b2_ref, w3_ref, b3_ref, o_ref):
    # fc1 with bias folded in: (16, 4) @ (4, TILE_B) -> (16, TILE_B).
    # Row 3 of x^T is constant ones; column 3 of w1a is b1. bf16 MXU inputs,
    # f32 accumulation, so only the ReLU remains as elementwise work.
    h1 = jnp.maximum(
        jnp.dot(w1a_ref[...], xT_ref[...], preferred_element_type=jnp.float32),
        0.0)
    # fc2: (8, 16) @ (16, TILE_B) in f32 (tiny K/N, avoids an un-fused bf16
    # materialization of the h1 slab), then bias + ReLU.
    h2 = jnp.maximum(
        jnp.dot(w2t_ref[...], h1, preferred_element_type=jnp.float32)
        + b2_ref[...],
        0.0)
    # fc3 (8 -> 1) on VPU multiply + XLU sublane-reduce: avoids an N=1 MXU op
    # and yields the result directly in lane-dense (1, TILE_B) orientation.
    logits = jnp.sum(h2 * w3_ref[...], axis=0, keepdims=True) + b3_ref[...]
    # Sigmoid on the EUP: exp + approximate reciprocal (no VALU divide).
    e = jnp.exp(-logits)
    o_ref[...] = pl.reciprocal(1.0 + e, approx=True).astype(o_ref.dtype)


def livenet_forward(x, params, *, tile_b=32768):
    """x: [B, 3] float32. params: w1 [3,16], b1 [16], w2 [16,8], b2 [8], w3 [8,1], b3 [1]."""
    B, F = x.shape
    assert F == IN_F

    # Keep the tile a multiple of 128 lanes; don't over-allocate for tiny B.
    tile_b = max(128, min(tile_b, pl.cdiv(B, 128) * 128))
    n_tiles = pl.cdiv(B, tile_b)

    # Lane-dense bf16 x^T with a constant-ones row appended (folds b1 into the
    # fc1 matmul). Single fused XLA pass; no batch padding.
    # TODO(synk): supply/store x feature-major ((3, B) bf16) upstream to remove
    # this transpose/cast pass from the critical path entirely.
    xT = jnp.concatenate(
        [x.T.astype(jnp.bfloat16), jnp.ones((1, B), jnp.bfloat16)], axis=0)

    w1a = jnp.concatenate(
        [params["w1"].T, params["b1"].reshape(H1, 1)], axis=1
    ).astype(jnp.bfloat16)                                     # (16, 4) = [W1^T | b1]
    w2t = params["w2"].T.astype(jnp.float32)                   # (8, 16)
    b2c = params["b2"].reshape(H2, 1).astype(jnp.float32)      # (8, 1)
    w3c = params["w3"].reshape(H2, 1).astype(jnp.float32)      # (8, 1)
    b3c = params["b3"].reshape(1, 1).astype(jnp.float32)       # (1, 1)

    resident = lambda shape: pl.BlockSpec(shape, lambda i: (0, 0))

    cost = pl.CostEstimate(
        flops=2 * B * ((IN_F + 1) * H1 + H1 * H2 + H2),
        transcendentals=2 * B,
        bytes_accessed=(xT.size * 2 + B * 4 + w1a.size * 2
                        + (w2t.size + b2c.size + w3c.size + b3c.size) * 4),
    )

    out = pl.pallas_call(
        livenet_kernel,
        out_shape=jax.ShapeDtypeStruct((1, B), jnp.float32),
        grid_spec=pltpu.PrefetchScalarGridSpec(
            num_scalar_prefetch=0,
            grid=(n_tiles,),
            in_specs=[
                pl.BlockSpec((IN_F + 1, tile_b), lambda i: (0, i)),  # streamed x^T
                resident(w1a.shape),                                 # resident weights
                resident(w2t.shape), resident(b2c.shape),
                resident(w3c.shape), resident(b3c.shape),
            ],
            out_specs=pl.BlockSpec((1, tile_b), lambda i: (0, i)),   # lane-dense out
        ),
        compiler_params=pltpu.CompilerParams(
            dimension_semantics=("parallel",),
            vmem_limit_bytes=32 * 1024 * 1024,
        ),
        cost_estimate=cost,
    )(xT, w1a, w2t, b2c, w3c, b3c)

    # (1, B) and (B, 1) are byte-identical in row-major order; this reshape is
    # a metadata-only bitcast under jit.
    return out.reshape(B, 1)


def init_params(key):
    """Deterministic init mirroring nn.Linear (weights stored as [in, out])."""
    ks = jax.random.split(key, 6)

    def lin(kw, kb, fan_in, fan_out):
        bound = 1.0 / float(fan_in) ** 0.5
        w = jax.random.uniform(kw, (fan_in, fan_out), jnp.float32, -bound, bound)
        b = jax.random.uniform(kb, (fan_out,), jnp.float32, -bound, bound)
        return w, b

    w1, b1 = lin(ks[0], ks[1], IN_F, H1)
    w2, b2 = lin(ks[2], ks[3], H1, H2)
    w3, b3 = lin(ks[4], ks[5], H2, 1)
    return {"w1": w1, "b1": b1, "w2": w2, "b2": b2, "w3": w3, "b3": b3}


def livenet_reference(x, p):
    # Reference applies the same bf16 quantization of the fc1 operands (x, w1,
    # b1) as the kernel's MXU stream; everything downstream is f32 like the
    # kernel, isolating kernel correctness.
    q = lambda a: a.astype(jnp.bfloat16).astype(jnp.float32)
    hi = jax.lax.Precision.HIGHEST
    h1 = jnp.maximum(jnp.dot(q(x), q(p["w1"]), precision=hi) + q(p["b1"]), 0.0)
    h2 = jnp.maximum(jnp.dot(h1, p["w2"], precision=hi) + p["b2"], 0.0)
    logits = jnp.dot(h2, p["w3"], precision=hi) + p["b3"]
    return jax.nn.sigmoid(logits).reshape(-1, 1)


if __name__ == "__main__":
    key = jax.random.PRNGKey(0)
    k_x, k_p = jax.random.split(key)

    batch = 8
    x = jax.random.normal(k_x, (batch, IN_F), jnp.float32)
    params = init_params(k_p)

    fwd = jax.jit(livenet_forward)
    out = jax.block_until_ready(fwd(x, params))
    ref = livenet_reference(x, params)

    assert out.shape == (batch, 1)
    # Tolerance covers bf16 fc1 quantization + EUP approximate reciprocal in the
    # sigmoid (outputs are in [0, 1]).
    assert jnp.allclose(out, ref, atol=2e-3, rtol=2e-3), "mismatch vs reference"

    print("KERNEL_OK")
</pallas_src>

<mosaic_0001>
module attributes {stable_mosaic.version = 11 : i64} {
  func.func @livenet_kernel(%arg0: i32, %arg1: memref<4x128xbf16, #tpu.memory_space<vmem>>, %arg2: memref<16x4xbf16, #tpu.memory_space<vmem>>, %arg3: memref<8x16xf32, #tpu.memory_space<vmem>>, %arg4: memref<8x1xf32, #tpu.memory_space<vmem>>, %arg5: memref<8x1xf32, #tpu.memory_space<vmem>>, %arg6: memref<1x1xf32, #tpu.memory_space<vmem>>, %arg7: memref<1x128xf32, #tpu.memory_space<vmem>>) attributes {dimension_semantics = [#tpu.dimension_semantics<parallel>], iteration_bounds = array<i64: 1>, scalar_prefetch = 0 : i64, scratch_operands = 0 : i64, tpu.core_type = #tpu.core_type<tc>, window_params = [{transform_indices = @transform_0, window_bounds = array<i64: 4, 128>}, {pipeline_mode = #tpu.pipeline_mode<synchronous>, transform_indices = @transform_1, window_bounds = array<i64: 16, 4>}, {pipeline_mode = #tpu.pipeline_mode<synchronous>, transform_indices = @transform_2, window_bounds = array<i64: 8, 16>}, {pipeline_mode = #tpu.pipeline_mode<synchronous>, transform_indices = @transform_3, window_bounds = array<i64: 8, 1>}, {pipeline_mode = #tpu.pipeline_mode<synchronous>, transform_indices = @transform_4, window_bounds = array<i64: 8, 1>}, {pipeline_mode = #tpu.pipeline_mode<synchronous>, transform_indices = @transform_5, window_bounds = array<i64: 1, 1>}, {transform_indices = @transform_6, window_bounds = array<i64: 1, 128>}]} {
    %c0 = arith.constant 0 : index
    %c0_0 = arith.constant 0 : index
    %0 = vector.load %arg2[%c0, %c0_0] : memref<16x4xbf16, #tpu.memory_space<vmem>>, vector<16x4xbf16>
    %c0_1 = arith.constant 0 : index
    %c0_2 = arith.constant 0 : index
    %1 = vector.load %arg1[%c0_1, %c0_2] : memref<4x128xbf16, #tpu.memory_space<vmem>>, vector<4x128xbf16>
    %cst = arith.constant dense<0.000000e+00> : vector<16x128xf32>
    %2 = tpu.matmul %0, %1, %cst {dimension_numbers = #tpu.dot_dimension_numbers<[1], [0], [0], [1], [0, 0, 1, 1], [], []>} : vector<16x4xbf16>, vector<4x128xbf16>, vector<16x128xf32> -> vector<16x128xf32>
    %cst_3 = arith.constant 0.000000e+00 : f32
    %3 = vector.broadcast %cst_3 : f32 to vector<16x128xf32>
    %4 = arith.maximumf %2, %3 : vector<16x128xf32>
    %c0_4 = arith.constant 0 : index
    %c0_5 = arith.constant 0 : index
    %5 = vector.load %arg3[%c0_4, %c0_5] : memref<8x16xf32, #tpu.memory_space<vmem>>, vector<8x16xf32>
    %cst_6 = arith.constant dense<0.000000e+00> : vector<8x128xf32>
    %6 = tpu.matmul %5, %4, %cst_6 {dimension_numbers = #tpu.dot_dimension_numbers<[1], [0], [0], [1], [0, 0, 1, 1], [], []>} : vector<8x16xf32>, vector<16x128xf32>, vector<8x128xf32> -> vector<8x128xf32>
    %c0_7 = arith.constant 0 : index
    %c0_8 = arith.constant 0 : index
    %7 = vector.load %arg4[%c0_7, %c0_8] : memref<8x1xf32, #tpu.memory_space<vmem>>, vector<8x1xf32>
    %8 = vector.broadcast %7 : vector<8x1xf32> to vector<8x128xf32>
    %9 = arith.addf %6, %8 : vector<8x128xf32>
    %cst_9 = arith.constant 0.000000e+00 : f32
    %10 = vector.broadcast %cst_9 : f32 to vector<8x128xf32>
    %11 = arith.maximumf %9, %10 : vector<8x128xf32>
    %c0_10 = arith.constant 0 : index
    %c0_11 = arith.constant 0 : index
    %12 = vector.load %arg5[%c0_10, %c0_11] : memref<8x1xf32, #tpu.memory_space<vmem>>, vector<8x1xf32>
    %13 = vector.broadcast %12 : vector<8x1xf32> to vector<8x128xf32>
    %14 = arith.mulf %11, %13 : vector<8x128xf32>
    %cst_12 = arith.constant dense<0.000000e+00> : vector<128xf32>
    %15 = vector.multi_reduction <add>, %14, %cst_12 [0] : vector<8x128xf32> to vector<128xf32>
    %16 = vector.shape_cast %15 : vector<128xf32> to vector<1x128xf32>
    %c0_13 = arith.constant 0 : index
    %c0_14 = arith.constant 0 : index
    %17 = vector.load %arg6[%c0_13, %c0_14] : memref<1x1xf32, #tpu.memory_space<vmem>>, vector<1x1xf32>
    %18 = vector.broadcast %17 : vector<1x1xf32> to vector<1x128xf32>
    %19 = arith.addf %16, %18 : vector<1x128xf32>
    %cst_15 = arith.constant 0.000000e+00 : f32
    %20 = vector.broadcast %cst_15 : f32 to vector<1x128xf32>
    %21 = arith.subf %20, %19 : vector<1x128xf32>
    %22 = math.exp %21 : vector<1x128xf32>
    %cst_16 = arith.constant 1.000000e+00 : f32
    %23 = vector.broadcast %cst_16 : f32 to vector<1x128xf32>
    %24 = arith.addf %23, %22 : vector<1x128xf32>
    %25 = tpu.reciprocal %24 {approx = true} : vector<1x128xf32> -> vector<1x128xf32>
    %c0_17 = arith.constant 0 : index
    %c0_18 = arith.constant 0 : index
    %26 = vector.load %arg7[%c0_17, %c0_18] : memref<1x128xf32, #tpu.memory_space<vmem>>, vector<1x128xf32>
    tpu.vector_store %arg7[%c0_17, %c0_18], %25 {strides = array<i32>} : memref<1x128xf32, #tpu.memory_space<vmem>>, vector<1x128xf32>,
    return
  }
  func.func @transform_0(%arg0: i32) -> (i32, i32) {
    %c0_i32 = arith.constant 0 : i32
    %c0_i32_0 = arith.constant 0 : i32
    return %c0_i32, %arg0 : i32, i32
  }
  func.func @transform_1(%arg0: i32) -> (i32, i32) {
    %c0_i32 = arith.constant 0 : i32
    %c0_i32_0 = arith.constant 0 : i32
    %c0_i32_1 = arith.constant 0 : i32
    return %c0_i32, %c0_i32_0 : i32, i32
  }
  func.func @transform_2(%arg0: i32) -> (i32, i32) {
    %c0_i32 = arith.constant 0 : i32
    %c0_i32_0 = arith.constant 0 : i32
    %c0_i32_1 = arith.constant 0 : i32
    return %c0_i32, %c0_i32_0 : i32, i32
  }
  func.func @transform_3(%arg0: i32) -> (i32, i32) {
    %c0_i32 = arith.constant 0 : i32
    %c0_i32_0 = arith.constant 0 : i32
    %c0_i32_1 = arith.constant 0 : i32
    return %c0_i32, %c0_i32_0 : i32, i32
  }
  func.func @transform_4(%arg0: i32) -> (i32, i32) {
    %c0_i32 = arith.constant 0 : i32
    %c0_i32_0 = arith.constant 0 : i32
    %c0_i32_1 = arith.constant 0 : i32
    return %c0_i32, %c0_i32_0 : i32, i32
  }
  func.func @transform_5(%arg0: i32) -> (i32, i32) {
    %c0_i32 = arith.constant 0 : i32
    %c0_i32_0 = arith.constant 0 : i32
    %c0_i32_1 = arith.constant 0 : i32
    return %c0_i32, %c0_i32_0 : i32, i32
  }
  func.func @transform_6(%arg0: i32) -> (i32, i32) {
    %c0_i32 = arith.constant 0 : i32
    %c0_i32_0 = arith.constant 0 : i32
    return %c0_i32, %arg0 : i32, i32
  }
}

</mosaic_0001>

<bundles_post_ra>
// kernel: livenet_forward.1
= control target key start
LH: loop header
LB: loop body
LE: loop exit
PB: predicated region body
PF: predicated region fallthrough
CT: control target
= control target key end

     0   :  { %s342_s0 = inlined_call_operand.vmem [shape: bf16[4,8], index: 0, kind: input, shape index: {}]   ;;  %s343_s1 = inlined_call_operand.vmem [shape: bf16[16,4], index: 1, kind: input, shape index: {}]   ;;  %s344_s2 = inlined_call_operand.vmem [shape: f32[8,16], index: 2, kind: input, shape index: {}]   ;;  %s345_s3 = inlined_call_operand.vmem [shape: f32[8,1], index: 3, kind: input, shape index: {}]   ;;  %s346_s4 = inlined_call_operand.vmem [shape: f32[8,1], index: 4, kind: input, shape index: {}]   ;;  %s347_s5 = inlined_call_operand.<no memory space> [shape: f32[1,1], index: 5, kind: input, shape index: {}]   ;;  %s348_s6 = inlined_call_operand.hbm [shape: f32[1,8], index: 6, kind: output, shape index: {}]  }
   0x1   :  { %v11_v0 = vstv %s347_s5 }
   0x2   :  { %12 = vst [vmem:[#allocation2] sm:$0x1] %v11_v0 }
   0x3   :  { %v29_v1 = vld [vmem:[%s342_s0] sm:$0x3]  ;;  %vm39_vm0 = vcmask 1041408   ;;  %v272_v2 = vmov 0.0   ;;  %vm273_vm1 = vmmov 0   ;;  %vm35_vm2 = vcmask 31744  }
   0x4   :  { %220 = vmatprep.subr.bf16.mxu0 %v272_v2  ;;  %v41_v3 = vsel %vm39_vm0, %v29_v1, 0  ;;  %222 = vmatprep.mubr.msk.bf16.mxu0 %vm273_vm1, %v272_v2  ;;  %v243_v4 = vld [vmem:[%s343_s1] sm:$0xff]  }
   0x5   :  { %221 = vmatpush3.bf16.msra.mxu0 %v41_v3  ;;  %230 = vmatprep.mubr.msk.f32.mxu1 %vm273_vm1, %v272_v2 }
   0x6   :  { %13 = vsyncpa [#allocation4], 0  ;;  %v274_v5 = vmov 0.0|0.0   ;;  %v87_v6 = vld [vmem:[%s345_s3] sm:$0xff]  ;;  %v275_v8 = vmov 0   ;;  %vm93_vm3 = vcmask 130048   ;;  %v187_v23 = vlaneseq }
   0x7   :  { %233 = vmatprep.subr.bf16.mxu1 %v274_v5  ;;  %241 = vset.pattern.permute.xlu0 %v275_v8  ;;  %v168_v9 = vld [vmem:[%s346_s4] sm:$0xff] }
   0x8   :  { %223 = vmatmul.mubr.msk.bf16.vlgmr.msra.gmra.mrb[0].mxu0 %vm35_vm2, %v243_v4  ;;  %242 = vset.pattern.permute.xlu1 %v275_v8  ;;  %v86_v17 = vld [vmem:[%s344_s2] sm:$0xff]  ;;  %v188_v27 = vshrl.u32 %v187_v23, 7  ;;  %s276_s2 = smov [#allocation3]  }
   0x9   :  { %v181_v7 = vld [vmem:[#allocation2] sm:$0x1]  ;;  %90 = vperm.xlu0 %241, %v87_v6   ;;  %s204_s4 = sshll.u32 %s276_s2, 4  ;;  %s205_s4 = int_to_ptr.vmem [resolvable:$true] %s204_s4 }
   0xa   :  { %184 = vperm.xlu1 %242, %v181_v7   ;;  %v189_v30 = vsub.s32 0, %v188_v27  ;;  %s248_s29 = scalar_lea.vmem %s205_s4, 16  ;;  %s252_s30 = scalar_lea.vmem %s205_s4, 32 }
   0xb   :  { %p249_p0 = scmp.ne.s32.totalorder %s205_s4, %s248_s29  ;;  %p253_p1 = scmp.lt.s32.totalorder %s205_s4, %s205_s4 }
   0xc   :  { %p254_p2 = scmp.lt.s32.totalorder %s252_s30, %s248_s29 }
   0xd   :  { %171 = vperm.xlu0 %241, %v168_v9  }
   0xe   :  { %p255_p3 = por %p254_p2, %p253_p1 }
  0x10   :  { %p256_p4 = pnand %p255_p3, %p249_p0 }
  0x88   :  { %v91_v18 = vpop.permute.xlu0 %90 }
  0x89   :  { %v185_v31 = vpop.permute.xlu1 %184 }
  0x8a   :  { %v190_v34 = vrot.slane %v185_v31, %v189_v30 }
  0x8c   :  { %v172_v24 = vpop.permute.xlu0 %171 }
  0xdb   :  { %v77_v10 = vpop.f32.mrb[0].mxu0 }
  0xdc   :  { %v224_v11 = vpop.f32.mrb[1].mxu0  ;;  %v84_v13 = vmax.f32 %v77_v10, 0.0 }
  0xdd   :  { %v80_v12 = vpop.f32.mrb[2].mxu0 }
  0xde   :  { %v85_v14 = vmax.f32 %v80_v12, 0.0  ;;  %v225_v15 = vpop.f32.mrb[3].mxu0 }
  0xe0   :  { %v234_v16 = vpack.c.bf16 %v85_v14, %v84_v13 }
  0xe2   :  { %235 = vmatpush3.bf16.msra.mxu1 %v234_v16 }
  0xe5   :  { %231 = vmatmul.mubr.msk.f32.vlgmr.msra.gmra.mrb[0].mxu1 %vm93_vm3, %v86_v17 }
 0x1b8   :  { %v163_v19 = vpop.f32.mrb[0].mxu1 }
 0x1b9   :  { %v164_v20 = vadd.f32 %v163_v19, %v91_v18  ;;  %v232_v21 = vpop.f32.mrb[1].mxu1 }
 0x1bb   :  { %v167_v22 = vmax.f32 %v164_v20, 0.0 }
 0x1bd   :  { %v174_v25 = vmul.f32 %v172_v24, %v167_v22 }
 0x1bf   :  { %v175_v26 = vrot.slane %v174_v25, 4 }
 0x1c1   :  { %v176_v28 = vadd.f32 %v175_v26, %v174_v25 }
 0x1c3   :  { %v177_v29 = vrot.slane %v176_v28, 2 }
 0x1c5   :  { %v178_v32 = vadd.f32 %v177_v29, %v176_v28 }
 0x1c7   :  { %v179_v33 = vrot.slane %v178_v32, 1 }
 0x1c9   :  { %v180_v35 = vadd.f32 %v179_v33, %v178_v32 }
 0x1cb   :  { %v191_v36 = vadd.f32 %v190_v34, %v180_v35 }
 0x1cd   :  { %v192_v37 = vsub.f32 0.0, %v191_v36 }
 0x1cf   :  { %v193_v38 = vmul.f32 1.442695, %v192_v37 }
 0x1d1   :  { %244 = vpow2.f32 %v193_v38 }
 0x1db   :  { %v245_v39 = vpop.eup %244 }
 0x1dc   :  { %v195_v40 = vadd.f32 1.0, %v245_v39 }
 0x1de   :  { %246 = vrcp.f32 %v195_v40 }
 0x1e8   :  { %v247_v41 = vpop.eup %246 }
 0x1e9   :  { %197 = vst [vmem:[#allocation3] sm:$0x1] %v247_v41 }
 0x1ea   :  { %259 = shalt.err (!%p256_p4)
}
 0x1eb   :  { %s260_s9 = scalar_lea.hbm %s348_s6, 16 }
 0x1ec   :  { %p261_p5 = scmp.ne.s32.totalorder %s348_s6, %s260_s9  ;;  %p264_p6 = scmp.lt.u32.totalorder %s260_s9, %s348_s6 }
 0x1ee   :  { %p266_p7 = pnand %p264_p6, %p261_p5 }
 0x1f0   :  { %269 = shalt.err (!%p266_p7)
}
 0x1f1   :  { %207 = dma.vmem_to_hbm [thread:$0]  %s205_s4, 16, %s348_s6, [#allocation4]  }
 0x1f2   :  { %270 = dma.done.wait [#allocation4], 16  }
 0x1f3   :  { %271 = vsyncadd [#allocation4], 4294967280 }
 0x1f4   :  { %211 = vsyncpa [#allocation4], 1 }

</bundles_post_ra>
